<compile_context>
chip_gen: v7x
topology: tpu7x:2x2x1
jax: 0.10.0
libtpu: 0.0.40
codegen_flags: <defaults>
</compile_context>

<pallas_src>
import functools

import jax
import jax.numpy as jnp
from jax import lax
from jax.experimental import pallas as pl
from jax.experimental.pallas import tpu as pltpu


# ---------------------------------------------------------------------------
# Prologue kernel: fused QKV projection, written head-major (B, H, T, D).
# ---------------------------------------------------------------------------
def _qkv_proj_kernel(x_ref, w_ref, q_ref, k_ref, v_ref, *, heads, dim_head,
                     scale):
    x_t = x_ref[0].astype(w_ref.dtype)                       # (tt, C)
    # One wide (tt, C) x (C, 3*H*D) MXU matmul for all heads / q,k,v at once.
    qkv = jnp.dot(x_t, w_ref[...], preferred_element_type=jnp.float32)
    hd = heads * dim_head
    for h in range(heads):                                   # static head split
        lo = h * dim_head
        hi = lo + dim_head
        q_ref[0, h] = (qkv[:, lo:hi] * scale).astype(q_ref.dtype)
        k_ref[0, h] = qkv[:, hd + lo:hd + hi].astype(k_ref.dtype)
        v_ref[0, h] = qkv[:, 2 * hd + lo:2 * hd + hi].astype(v_ref.dtype)


# ---------------------------------------------------------------------------
# Flash-style causal attention + output projection.
# ---------------------------------------------------------------------------
def _flash_attn_kernel(q_ref, k_ref, v_ref, wo_ref, bo_ref, o_ref,
                       m_scr, l_scr, acc_scr, *, tq, tk, compute_dtype):
    qi = pl.program_id(1)
    ki = pl.program_id(2)

    @pl.when(ki == 0)
    def _init():
        m_scr[...] = jnp.full_like(m_scr, -1e30)
        l_scr[...] = jnp.zeros_like(l_scr)
        acc_scr[...] = jnp.zeros_like(acc_scr)

    def _kv_step(masked):
        q = q_ref[0]                                         # (H, tq, D)
        k = k_ref[0]                                         # (H, tk, D)
        v = v_ref[0]                                         # (H, tk, D)
        s = jnp.einsum('hqd,hkd->hqk', q, k,
                       preferred_element_type=jnp.float32)   # f32 (H, tq, tk)
        if masked:
            # Diagonal tile only (qi == ki, tq == tk): global offsets cancel.
            row = lax.broadcasted_iota(jnp.int32, (tq, tk), 0)
            col = lax.broadcasted_iota(jnp.int32, (tq, tk), 1)
            s = jnp.where((row >= col)[None], s, -1e30)      # finite: no NaNs
        m_prev = m_scr[...]
        m_new = jnp.maximum(m_prev, jnp.max(s, axis=-1, keepdims=True))
        alpha = jnp.exp(m_prev - m_new)                      # f32 softmax math
        p = jnp.exp(s - m_new)
        l_scr[...] = alpha * l_scr[...] + jnp.sum(p, axis=-1, keepdims=True)
        acc_scr[...] = alpha * acc_scr[...] + jnp.einsum(
            'hqk,hkd->hqd', p.astype(compute_dtype), v,
            preferred_element_type=jnp.float32)
        m_scr[...] = m_new

    # Interior tiles: strictly below the causal diagonal -> no mask math.
    @pl.when(ki < qi)
    def _interior():
        _kv_step(masked=False)

    # Diagonal tile: masked step, then finalize + one lane-dense store.
    # (ki > qi tiles do neither compute nor DMA: kv index_map is clamped.)
    @pl.when(ki == qi)
    def _diag_and_finalize():
        _kv_step(masked=True)
        inv_l = pl.reciprocal(l_scr[...], approx=True)       # EUP vrcp
        ctx = (acc_scr[...] * inv_l).astype(compute_dtype)   # (H, tq, D)
        # Fold heads through head-major W_out: batched matmul + major-axis
        # sum (avoids an in-kernel (H,tq,D)->(tq,H*D) relayout).
        yh = jnp.einsum('hqd,hdc->hqc', ctx, wo_ref[...],
                        preferred_element_type=jnp.float32)  # (H, tq, C)
        y = jnp.sum(yh, axis=0) + bo_ref[...].astype(jnp.float32)
        o_ref[0] = y.astype(o_ref.dtype)


def _pick_tile(T: int, B: int) -> int:
    """Largest of (256, 128) dividing T; drop to 128 when that keeps >= 2
    parallel grid points (v7x has 2 TensorCores).  Small T: one full tile."""
    for t in (256, 128):
        if T % t == 0:
            if B * (T // t) < 2 and T % 128 == 0 and T // 128 >= 2:
                return 128
            return t
    # TODO(synk): pad T up to a multiple of 128 for long, non-divisible
    # sequences instead of falling back to a single full-length tile.
    return T


def mask_attention(x, w_qkv, w_out, b_out, *, heads, dim_head,
                   compute_dtype=jnp.bfloat16):
    """x: (B, T, C); w_qkv: (C, 3*inner); w_out: (inner, C); b_out: (1, C).

    compute_dtype is the MXU operand dtype (bf16 by default; pass jnp.float32
    for near bit-exact results at lower MXU throughput)."""
    B, T, C = x.shape
    inner = heads * dim_head
    assert w_qkv.shape == (C, 3 * inner)
    assert w_out.shape == (inner, C)
    assert b_out.shape == (1, C)
    scale = dim_head ** (-0.5)
    compute_dtype = jnp.dtype(compute_dtype)

    tile = _pick_tile(T, B)
    tq = tk = tile          # tq == tk: diagonal tile is exactly ki == qi
    n_q = T // tq
    n_k = T // tk

    cb = compute_dtype.itemsize
    xb = jnp.dtype(x.dtype).itemsize

    # ---- 1) QKV projection prologue: x (B,T,C) -> q,k,v (B,H,T,D), q scaled
    w_qkv_c = w_qkv.astype(compute_dtype)
    est_p = (2 * tile * C * xb                        # x block (double-buffered)
             + 2 * C * 3 * inner * cb                 # resident qkv weight
             + 3 * 2 * heads * tile * dim_head * cb   # q/k/v output blocks
             + 2 * tile * 3 * inner * 4)              # f32 matmul temporary
    vmem_p = int(min(max(2 * est_p, 32 << 20), 48 << 20))
    proj = pl.pallas_call(
        functools.partial(_qkv_proj_kernel, heads=heads, dim_head=dim_head,
                          scale=scale),
        out_shape=(
            jax.ShapeDtypeStruct((B, heads, T, dim_head), compute_dtype),
            jax.ShapeDtypeStruct((B, heads, T, dim_head), compute_dtype),
            jax.ShapeDtypeStruct((B, heads, T, dim_head), compute_dtype),
        ),
        grid=(B, n_q),
        in_specs=[
            pl.BlockSpec((1, tile, C), lambda b, ti: (b, ti, 0)),
            pl.BlockSpec((C, 3 * inner), lambda b, ti: (0, 0)),   # resident
        ],
        out_specs=(
            pl.BlockSpec((1, heads, tile, dim_head), lambda b, ti: (b, 0, ti, 0)),
            pl.BlockSpec((1, heads, tile, dim_head), lambda b, ti: (b, 0, ti, 0)),
            pl.BlockSpec((1, heads, tile, dim_head), lambda b, ti: (b, 0, ti, 0)),
        ),
        compiler_params=pltpu.CompilerParams(
            dimension_semantics=("parallel", "parallel"),
            vmem_limit_bytes=vmem_p),
    )
    q, k, v = proj(x, w_qkv_c)

    # ---- 2) Flash attention over (B, query tiles, kv tiles) ---------------
    wo3 = w_out.reshape(heads, dim_head, C).astype(compute_dtype)

    est_f = (3 * 2 * heads * tile * dim_head * cb     # q/k/v blocks
             + 2 * tq * C * xb                        # output block
             + 2 * (heads * dim_head * C + C) * cb    # resident W_out + bias
             + heads * tq * (dim_head + 2) * 4        # flash scratch (f32)
             + 3 * heads * tq * tk * 4)               # s / p temporaries (f32)
    # 48 MiB keeps ~16 MiB headroom on v7x (64 MiB physical VMEM); v5e/v6e
    # (128 MiB) could raise this and use tq=512 for long sequences.
    vmem_f = int(min(max(2 * est_f, 32 << 20), 48 << 20))

    flash = pl.pallas_call(
        functools.partial(_flash_attn_kernel, tq=tq, tk=tk,
                          compute_dtype=compute_dtype),
        out_shape=jax.ShapeDtypeStruct((B, T, C), x.dtype),
        grid=(B, n_q, n_k),
        in_specs=[
            pl.BlockSpec((1, heads, tq, dim_head),
                         lambda b, qi, ki: (b, 0, qi, 0)),
            # Clamp to the diagonal: fully-masked tiles repeat the previous
            # block index, so Pallas skips their DMA entirely.
            pl.BlockSpec((1, heads, tk, dim_head),
                         lambda b, qi, ki: (b, 0, jnp.minimum(ki, qi), 0)),
            pl.BlockSpec((1, heads, tk, dim_head),
                         lambda b, qi, ki: (b, 0, jnp.minimum(ki, qi), 0)),
            pl.BlockSpec((heads, dim_head, C), lambda b, qi, ki: (0, 0, 0)),
            pl.BlockSpec((1, C), lambda b, qi, ki: (0, 0)),
        ],
        out_specs=pl.BlockSpec((1, tq, C), lambda b, qi, ki: (b, qi, 0)),
        scratch_shapes=[
            pltpu.VMEM((heads, tq, 1), jnp.float32),        # running max m
            pltpu.VMEM((heads, tq, 1), jnp.float32),        # running denom l
            pltpu.VMEM((heads, tq, dim_head), jnp.float32), # running PV acc
        ],
        compiler_params=pltpu.CompilerParams(
            dimension_semantics=("parallel", "parallel", "arbitrary"),
            vmem_limit_bytes=vmem_f),
    )
    # TODO(synk): when C < 128, pad C (and inner) to a multiple of 128 in this
    # wrapper so the output store / W_out matmul are fully lane-dense.
    return flash(q, k, v, wo3, b_out)


def mask_attention_ref(x, w_qkv, w_out, b_out, *, heads, dim_head):
    """Pure-JAX reference matching the PyTorch forward."""
    B, T, C = x.shape
    inner = heads * dim_head
    scale = dim_head ** (-0.5)
    qkv = x @ w_qkv                                            # (B, T, 3*inner)
    q, k, v = jnp.split(qkv, 3, axis=-1)
    def split_heads(t):
        return t.reshape(B, T, heads, dim_head).transpose(0, 2, 1, 3)
    q, k, v = map(split_heads, (q, k, v))                      # (B, H, T, D)
    dots = jnp.einsum('bhtd,bhsd->bhts', q, k) * scale
    causal = jnp.tril(jnp.ones((T, T), dtype=bool))
    dots = jnp.where(causal[None, None], dots, -jnp.inf)
    attn = jax.nn.softmax(dots, axis=-1)
    out = jnp.einsum('bhts,bhsd->bhtd', attn, v)
    out = out.transpose(0, 2, 1, 3).reshape(B, T, inner)
    return out @ w_out + b_out[0]


if __name__ == "__main__":
    key = jax.random.PRNGKey(0)

    # Case 1: small shapes consistent with the module (single-tile path).
    B, T, dim = 2, 8, 32
    heads, dim_head = 2, 16
    inner = heads * dim_head
    kx, kq, ko, kb = jax.random.split(key, 4)
    x = jax.random.normal(kx, (B, T, dim), dtype=jnp.float32)
    w_qkv = jax.random.normal(kq, (dim, 3 * inner), dtype=jnp.float32) * 0.05
    w_out = jax.random.normal(ko, (inner, dim), dtype=jnp.float32) * 0.05
    b_out = jax.random.normal(kb, (1, dim), dtype=jnp.float32) * 0.05

    y = mask_attention(x, w_qkv, w_out, b_out, heads=heads, dim_head=dim_head)
    y = jax.block_until_ready(y)
    y_ref = mask_attention_ref(x, w_qkv, w_out, b_out,
                               heads=heads, dim_head=dim_head)
    assert y.shape == (B, T, dim)
    # bf16 MXU operands (f32 accumulation) + approx reciprocal: ~1e-3 error.
    assert jnp.allclose(y, y_ref, atol=2e-2, rtol=2e-2), "mismatch vs reference"

    # Case 2: longer sequence exercising the tiled flash path: interior
    # (unmasked) tiles, diagonal-only masking, DMA-skipped upper-triangle
    # tiles, and >= 2 parallel query-tile grid points.
    B2, T2 = 1, 256
    x2 = jax.random.normal(jax.random.fold_in(key, 1), (B2, T2, dim),
                           dtype=jnp.float32)
    y2 = mask_attention(x2, w_qkv, w_out, b_out, heads=heads, dim_head=dim_head)
    y2 = jax.block_until_ready(y2)
    y2_ref = mask_attention_ref(x2, w_qkv, w_out, b_out,
                                heads=heads, dim_head=dim_head)
    assert y2.shape == (B2, T2, dim)
    assert jnp.allclose(y2, y2_ref, atol=2e-2, rtol=2e-2), "mismatch (tiled)"

    print("KERNEL_OK")
</pallas_src>

<mosaic_0001>
module attributes {stable_mosaic.version = 11 : i64} {
  func.func @_qkv_proj_kernel(%arg0: i32, %arg1: i32, %arg2: memref<1x8x32xf32, #tpu.memory_space<vmem>>, %arg3: memref<32x96xbf16, #tpu.memory_space<vmem>>, %arg4: memref<1x2x8x16xbf16, #tpu.memory_space<vmem>>, %arg5: memref<1x2x8x16xbf16, #tpu.memory_space<vmem>>, %arg6: memref<1x2x8x16xbf16, #tpu.memory_space<vmem>>) attributes {dimension_semantics = [#tpu.dimension_semantics<parallel>, #tpu.dimension_semantics<parallel>], iteration_bounds = array<i64: 2, 1>, scalar_prefetch = 0 : i64, scratch_operands = 0 : i64, tpu.core_type = #tpu.core_type<tc>, window_params = [{transform_indices = @transform_0, window_bounds = array<i64: 1, 8, 32>}, {pipeline_mode = #tpu.pipeline_mode<synchronous>, transform_indices = @transform_1, window_bounds = array<i64: 32, 96>}, {transform_indices = @transform_2, window_bounds = array<i64: 1, 2, 8, 16>}, {transform_indices = @transform_3, window_bounds = array<i64: 1, 2, 8, 16>}, {transform_indices = @transform_4, window_bounds = array<i64: 1, 2, 8, 16>}]} {
    %c0 = arith.constant 0 : index
    %c0_0 = arith.constant 0 : index
    %c0_1 = arith.constant 0 : index
    %0 = vector.load %arg2[%c0, %c0_0, %c0_1] : memref<1x8x32xf32, #tpu.memory_space<vmem>>, vector<1x8x32xf32>
    %1 = vector.shape_cast %0 : vector<1x8x32xf32> to vector<8x32xf32>
    %2 = arith.truncf %1 : vector<8x32xf32> to vector<8x32xbf16>
    %c0_2 = arith.constant 0 : index
    %c0_3 = arith.constant 0 : index
    %3 = vector.load %arg3[%c0_2, %c0_3] : memref<32x96xbf16, #tpu.memory_space<vmem>>, vector<32x96xbf16>
    %cst = arith.constant dense<0.000000e+00> : vector<8x96xf32>
    %4 = tpu.matmul %2, %3, %cst {dimension_numbers = #tpu.dot_dimension_numbers<[1], [0], [0], [1], [0, 0, 1, 1], [], []>} : vector<8x32xbf16>, vector<32x96xbf16>, vector<8x96xf32> -> vector<8x96xf32>
    %5 = vector.extract_strided_slice %4 {offsets = [0, 0], sizes = [8, 16], strides = [1, 1]} : vector<8x96xf32> to vector<8x16xf32>
    %cst_4 = arith.constant 2.500000e-01 : f32
    %6 = vector.broadcast %cst_4 : f32 to vector<8x16xf32>
    %7 = arith.mulf %5, %6 : vector<8x16xf32>
    %8 = arith.truncf %7 : vector<8x16xf32> to vector<8x16xbf16>
    %c0_5 = arith.constant 0 : index
    %c0_6 = arith.constant 0 : index
    %c0_7 = arith.constant 0 : index
    %c0_8 = arith.constant 0 : index
    %9 = vector.load %arg4[%c0_5, %c0_6, %c0_7, %c0_8] : memref<1x2x8x16xbf16, #tpu.memory_space<vmem>>, vector<1x1x8x16xbf16>
    %10 = vector.shape_cast %9 : vector<1x1x8x16xbf16> to vector<8x16xbf16>
    %11 = vector.shape_cast %8 : vector<8x16xbf16> to vector<1x1x8x16xbf16>
    tpu.vector_store %arg4[%c0_5, %c0_6, %c0_7, %c0_8], %11 {strides = array<i32>} : memref<1x2x8x16xbf16, #tpu.memory_space<vmem>>, vector<1x1x8x16xbf16>,
    %12 = vector.extract_strided_slice %4 {offsets = [0, 32], sizes = [8, 16], strides = [1, 1]} : vector<8x96xf32> to vector<8x16xf32>
    %13 = arith.truncf %12 : vector<8x16xf32> to vector<8x16xbf16>
    %c0_9 = arith.constant 0 : index
    %c0_10 = arith.constant 0 : index
    %c0_11 = arith.constant 0 : index
    %c0_12 = arith.constant 0 : index
    %14 = vector.load %arg5[%c0_9, %c0_10, %c0_11, %c0_12] : memref<1x2x8x16xbf16, #tpu.memory_space<vmem>>, vector<1x1x8x16xbf16>
    %15 = vector.shape_cast %14 : vector<1x1x8x16xbf16> to vector<8x16xbf16>
    %16 = vector.shape_cast %13 : vector<8x16xbf16> to vector<1x1x8x16xbf16>
    tpu.vector_store %arg5[%c0_9, %c0_10, %c0_11, %c0_12], %16 {strides = array<i32>} : memref<1x2x8x16xbf16, #tpu.memory_space<vmem>>, vector<1x1x8x16xbf16>,
    %17 = vector.extract_strided_slice %4 {offsets = [0, 64], sizes = [8, 16], strides = [1, 1]} : vector<8x96xf32> to vector<8x16xf32>
    %18 = arith.truncf %17 : vector<8x16xf32> to vector<8x16xbf16>
    %c0_13 = arith.constant 0 : index
    %c0_14 = arith.constant 0 : index
    %c0_15 = arith.constant 0 : index
    %c0_16 = arith.constant 0 : index
    %19 = vector.load %arg6[%c0_13, %c0_14, %c0_15, %c0_16] : memref<1x2x8x16xbf16, #tpu.memory_space<vmem>>, vector<1x1x8x16xbf16>
    %20 = vector.shape_cast %19 : vector<1x1x8x16xbf16> to vector<8x16xbf16>
    %21 = vector.shape_cast %18 : vector<8x16xbf16> to vector<1x1x8x16xbf16>
    tpu.vector_store %arg6[%c0_13, %c0_14, %c0_15, %c0_16], %21 {strides = array<i32>} : memref<1x2x8x16xbf16, #tpu.memory_space<vmem>>, vector<1x1x8x16xbf16>,
    %22 = vector.extract_strided_slice %4 {offsets = [0, 16], sizes = [8, 16], strides = [1, 1]} : vector<8x96xf32> to vector<8x16xf32>
    %cst_17 = arith.constant 2.500000e-01 : f32
    %23 = vector.broadcast %cst_17 : f32 to vector<8x16xf32>
    %24 = arith.mulf %22, %23 : vector<8x16xf32>
    %25 = arith.truncf %24 : vector<8x16xf32> to vector<8x16xbf16>
    %c0_18 = arith.constant 0 : index
    %c1 = arith.constant 1 : index
    %c0_19 = arith.constant 0 : index
    %c0_20 = arith.constant 0 : index
    %26 = vector.load %arg4[%c0_18, %c1, %c0_19, %c0_20] : memref<1x2x8x16xbf16, #tpu.memory_space<vmem>>, vector<1x1x8x16xbf16>
    %27 = vector.shape_cast %26 : vector<1x1x8x16xbf16> to vector<8x16xbf16>
    %28 = vector.shape_cast %25 : vector<8x16xbf16> to vector<1x1x8x16xbf16>
    tpu.vector_store %arg4[%c0_18, %c1, %c0_19, %c0_20], %28 {strides = array<i32>} : memref<1x2x8x16xbf16, #tpu.memory_space<vmem>>, vector<1x1x8x16xbf16>,
    %29 = vector.extract_strided_slice %4 {offsets = [0, 48], sizes = [8, 16], strides = [1, 1]} : vector<8x96xf32> to vector<8x16xf32>
    %30 = arith.truncf %29 : vector<8x16xf32> to vector<8x16xbf16>
    %c0_21 = arith.constant 0 : index
    %c1_22 = arith.constant 1 : index
    %c0_23 = arith.constant 0 : index
    %c0_24 = arith.constant 0 : index
    %31 = vector.load %arg5[%c0_21, %c1_22, %c0_23, %c0_24] : memref<1x2x8x16xbf16, #tpu.memory_space<vmem>>, vector<1x1x8x16xbf16>
    %32 = vector.shape_cast %31 : vector<1x1x8x16xbf16> to vector<8x16xbf16>
    %33 = vector.shape_cast %30 : vector<8x16xbf16> to vector<1x1x8x16xbf16>
    tpu.vector_store %arg5[%c0_21, %c1_22, %c0_23, %c0_24], %33 {strides = array<i32>} : memref<1x2x8x16xbf16, #tpu.memory_space<vmem>>, vector<1x1x8x16xbf16>,
    %34 = vector.extract_strided_slice %4 {offsets = [0, 80], sizes = [8, 16], strides = [1, 1]} : vector<8x96xf32> to vector<8x16xf32>
    %35 = arith.truncf %34 : vector<8x16xf32> to vector<8x16xbf16>
    %c0_25 = arith.constant 0 : index
    %c1_26 = arith.constant 1 : index
    %c0_27 = arith.constant 0 : index
    %c0_28 = arith.constant 0 : index
    %36 = vector.load %arg6[%c0_25, %c1_26, %c0_27, %c0_28] : memref<1x2x8x16xbf16, #tpu.memory_space<vmem>>, vector<1x1x8x16xbf16>
    %37 = vector.shape_cast %36 : vector<1x1x8x16xbf16> to vector<8x16xbf16>
    %38 = vector.shape_cast %35 : vector<8x16xbf16> to vector<1x1x8x16xbf16>
    tpu.vector_store %arg6[%c0_25, %c1_26, %c0_27, %c0_28], %38 {strides = array<i32>} : memref<1x2x8x16xbf16, #tpu.memory_space<vmem>>, vector<1x1x8x16xbf16>,
    return
  }
  func.func @transform_0(%arg0: i32, %arg1: i32) -> (i32, i32, i32) {
    %c0_i32 = arith.constant 0 : i32
    %c0_i32_0 = arith.constant 0 : i32
    return %arg0, %arg1, %c0_i32 : i32, i32, i32
  }
  func.func @transform_1(%arg0: i32, %arg1: i32) -> (i32, i32) {
    %c0_i32 = arith.constant 0 : i32
    %c0_i32_0 = arith.constant 0 : i32
    %c0_i32_1 = arith.constant 0 : i32
    return %c0_i32, %c0_i32_0 : i32, i32
  }
  func.func @transform_2(%arg0: i32, %arg1: i32) -> (i32, i32, i32, i32) {
    %c0_i32 = arith.constant 0 : i32
    %c0_i32_0 = arith.constant 0 : i32
    %c0_i32_1 = arith.constant 0 : i32
    return %arg0, %c0_i32, %arg1, %c0_i32_0 : i32, i32, i32, i32
  }
  func.func @transform_3(%arg0: i32, %arg1: i32) -> (i32, i32, i32, i32) {
    %c0_i32 = arith.constant 0 : i32
    %c0_i32_0 = arith.constant 0 : i32
    %c0_i32_1 = arith.constant 0 : i32
    return %arg0, %c0_i32, %arg1, %c0_i32_0 : i32, i32, i32, i32
  }
  func.func @transform_4(%arg0: i32, %arg1: i32) -> (i32, i32, i32, i32) {
    %c0_i32 = arith.constant 0 : i32
    %c0_i32_0 = arith.constant 0 : i32
    %c0_i32_1 = arith.constant 0 : i32
    return %arg0, %c0_i32, %arg1, %c0_i32_0 : i32, i32, i32, i32
  }
}

</mosaic_0001>

<bundles_post_ra>
// kernel: tpu_custom_call.1
= control target key start
LH: loop header
LB: loop body
LE: loop exit
PB: predicated region body
PF: predicated region fallthrough
CT: control target
= control target key end

     0   :  { %s1275_s0 = inlined_call_operand.hbm [shape: f32[2,8,32], index: 0, kind: input, shape index: {}]   ;;  %s1276_s1 = inlined_call_operand.hbm [shape: bf16[32,96], index: 1, kind: input, shape index: {}]   ;;  %s1277_s2 = inlined_call_operand.hbm [shape: bf16[2,2,8,16], index: 2, kind: output, shape index: {0}]   ;;  %s1278_s3 = inlined_call_operand.hbm [shape: bf16[2,2,8,16], index: 3, kind: output, shape index: {1}]   ;;  %s1279_s4 = inlined_call_operand.hbm [shape: bf16[2,2,8,16], index: 4, kind: output, shape index: {2}]  }
   0x1   :  { %1286 = sst [smem:[#allocation15_spill]] %s1275_s0 }
   0x2   :  { %1287 = sst [smem:[#allocation16_spill]] %s1276_s1 }
   0x3   :  { %10 = vsyncpa [#allocation3], 0 }
   0x4   :  { %12 = vsyncpa [#allocation3 + $0x1], 0 }
   0x5   :  { %13 = vsyncpa [#allocation6], 0 }
   0x6   :  { %14 = vsyncpa [#allocation4], 0 }
   0x7   :  { %16 = vsyncpa [#allocation4 + $0x1], 0 }
   0x8   :  { %17 = vsyncpa [#allocation9], 0 }
   0x9   :  { %19 = vsyncpa [#allocation9 + $0x1], 0  ;;  %s971_s15 = smov 0   ;;  %s973_s16 = smov 0  }
   0xa   :  { %s975_s17 = smov 0   ;;  %s977_s18 = smov 0  }
   0xb   :  { %s979_s19 = smov 0   ;;  %s981_s20 = smov 0  }
   0xc LB: > { %s1002_s21 = sadd.s32 4294967295, %s929_s20   ;;  %s1283_s22 = sadd.s32 4294967294, %s929_s20   ;;  %s929_s20 = sphi %s981_s20, %s25_s20   ;;  %s925_s19 = sphi %s979_s19, %s1310_s19   ;;  %s921_s18 = sphi %s977_s18, %s1309_s18   ;;  %s917_s17 = sphi %s975_s17, %s1308_s17   ;;  %s913_s16 = sphi %s973_s16, %s1307_s16   ;;  %s909_s15 = sphi %s971_s15, %s1306_s15  }
   0xd   : > { %p59_p0 = scmp.ne.s32.totalorder %s913_s16, %s909_s15  ;;  %p1280_p1 = scmp.eq.s32.totalorder %s1002_s21, 0 }
   0xe   : > { %p112_p3 = scmp.eq.s32.totalorder %s1283_s22, 1  ;;  %p584_p5 = scmp.ge.s32.totalorder %s929_s20, 1 }
   0xf   : > { %p1013_p4 = por %p1280_p1, %p59_p0  ;;  %p175_p7 = scmp.lt.s32.totalorder %s929_s20, 3 }
  0x10   : > { %p1018_p6 = por %p112_p3, %p59_p0  ;;  %s931_s26 = smov [#allocation5]  }
  0x11   : > { %s1288_s23 = scalar_select %p1013_p4, 1, 0 }
  0x12   : > { %s1289_s24 = scalar_select %p1018_p6, 1, 0 }
  0x13   : > { %p1023_p8 = pnand %p584_p5, %p175_p7  ;;  %s187_s27 = sshll.u32 %s931_s26, 4  ;;  %s188_s27 = int_to_ptr.vmem [resolvable:$true] %s187_s27 }
  0x14   : > { %s37_s29 = sadd.s32 1, %s925_s19  ;;  %s1292_s1 = sld [smem:[#allocation16_spill]] }
  0x15   : > { %s1290_s25 = scalar_select %p1023_p8, 1, 0 }
  0x16   : > { %p642_p9 = pneg %p1023_p8 }
  0x18   : > { %p1032_p11 = pnand %p642_p9, %p1280_p1 }
  0x1a   : > { %s725_s6 = scalar_lea.hbm %s1292_s1, 256  ;;  %p727_p13 = pneg %p1032_p11 }
  0x1b   : > { %p726_p12 = scmp.ne.s32.totalorder %s1292_s1, %s725_s6  ;;  %p732_p5 = scmp.lt.u32.totalorder %s725_s6, %s1292_s1 }
  0x1d   : > { %p728_p0 = pnand %p727_p13, %p726_p12 }
  0x1f   : > { %p729_p3 = pneg %p728_p0 }
  0x21   : > { %p734_p7 = pnand %p732_p5, %p729_p3 }
  0x23   : > { %737 = shalt.err (!%p734_p7)
}
  0x24   : > { %s738_s11 = scalar_lea.vmem %s188_s27, 256  ;;  %p746_p2 = scmp.lt.s32.totalorder %s188_s27, %s188_s27 }
  0x25   : > { %p739_p9 = scmp.ne.s32.totalorder %s188_s27, %s738_s11  ;;  %p747_p6 = scmp.lt.s32.totalorder %s738_s11, %s738_s11 }
  0x27   : > { %p741_p10 = pnand %p739_p9, %p727_p13  ;;  %p748_p4 = por %p747_p6, %p746_p2 }
  0x29   : > { %p742_p1 = pneg %p741_p10 }
  0x2b   : > { %p749_p8 = pnand %p748_p4, %p742_p1 }
  0x2d   : > { %752 = shalt.err (!%p749_p8)
}
  0x2e   : > { %s932_s12 = smov 64   ;;  %s933_s13 = smov 4  }
  0x2f   : > { %645 = dma.hbm_to_vmem [thread:$0]  (!%p1032_p11), %s1292_s1, 256, %s188_s27, [#allocation6], %s932_s12, %s932_s12, %s933_s13  }
  0x30   : > { %p39_p1 = scmp.ge.s32.totalorder %s37_s29, 2  ;;  %s46_s30 = sadd.s32 1, %s917_s17 }
  0x31   : > { %p53_p2 = scmp.ne.s32.totalorder %s917_s17, %s913_s16  ;;  %p54_p4 = scmp.eq.s32.totalorder %s929_s20, 0 }
  0x32   : > { %s1312_s29 = smov (%p39_p1, %s37_s29), 0  ;;  %p1294_p8 = scmp.eq.s32.totalorder %s1002_s21, 1 }
  0x33   : > { %p1059_p6 = por %p54_p4, %p53_p2  ;;  %s41_s28 = ssub.s32 %s925_s19, %s1312_s29 }
  0x34   : > { %p1065_p10 = por %p1294_p8, %p53_p2  ;;  %p661_p12 = scmp.lt.s32.totalorder %s929_s20, 2 }
  0x35   : > { %p44_p11 = scmp.eq.s32.totalorder %s41_s28, 0  ;;  %s201_s27 = sand.u32 1, %s917_s17  }
  0x36   : > { %s587_s7 = sshll.u32 %s201_s27, 3  ;;  %s588_s9 = sshll.u32 %s925_s19, 7 }
  0x37   : > { %s1074_s8 = scalar_select %p44_p11, %s917_s17, %s46_s30  }
  0x38   : > { %s1296_s0 = sld [smem:[#allocation15_spill]]  ;;  %s205_s13 = scalar_lea.vmem [#allocation2], %s587_s7 }
  0x39   : > { %s213_s14 = sshll.u32 %s205_s13, 4  ;;  %p1086_p13 = pnand %p661_p12, %p1059_p6  ;;  %s1082_s14 = int_to_ptr.vmem [resolvable:$true] %s213_s14 }
  0x3a   : > { %s202_s30 = scalar_lea.sflag [#allocation3], %s201_s27 }
  0x3b   : > { %p755_p3 = pneg %p1086_p13 }
  0x3e   : > { %s1080_s12 = scalar_lea.hbm %s1296_s0, %s588_s9  ;;  %s758_s10 = scalar_lea.hbm %s1296_s0, 256 }
  0x3f   : > { %s753_s28 = scalar_lea.hbm %s1080_s12, 128  ;;  %p759_p9 = scmp.lt.u32.totalorder %s1080_s12, %s1296_s0 }
  0x40   : > { %p754_p0 = scmp.ne.s32.totalorder %s1080_s12, %s753_s28  ;;  %p760_p1 = scmp.lt.u32.totalorder %s758_s10, %s753_s28 }
  0x41   : > { %p762_p4 = scmp.lt.u32.totalorder %s753_s28, %s1080_s12 }
  0x42   : > { %p756_p5 = pnand %p755_p3, %p754_p0  ;;  %p761_p2 = por %p760_p1, %p759_p9 }
  0x44   : > { %p757_p7 = pneg %p756_p5  ;;  %p763_p6 = por %p762_p4, %p761_p2 }
  0x46   : > { %p764_p8 = pnand %p763_p6, %p757_p7 }
  0x48   : > { %767 = shalt.err (!%p764_p8)
}
  0x49   : > { %s768_s27 = scalar_lea.vmem %s1082_s14, 128  ;;  %s934_s13 = smov [#allocation2]  }
  0x4a   : > { %p769_p12 = scmp.ne.s32.totalorder %s1082_s14, %s768_s27  ;;  %s773_s7 = sshll.u32 %s934_s13, 4  ;;  %s774_s7 = int_to_ptr.vmem [resolvable:$false] %s773_s7 }
  0x4b   : > { %s775_s9 = scalar_lea.vmem %s774_s7, 256  ;;  %p776_p5 = scmp.lt.s32.totalorder %s1082_s14, %s774_s7 }
  0x4c   : > { %p771_p11 = pnand %p769_p12, %p755_p3  ;;  %p777_p9 = scmp.lt.s32.totalorder %s775_s9, %s768_s27 }
  0x4e   : > { %p772_p0 = pneg %p771_p11  ;;  %p778_p1 = por %p777_p9, %p776_p5 }
  0x50   : > { %p779_p2 = pnand %p778_p1, %p772_p0 }
  0x52   : > { %782 = shalt.err (!%p779_p2)
}
  0x53   : > { %649 = dma.hbm_to_vmem [thread:$0]  (!%p1086_p13), %s1080_s12, 128, %s1082_s14, %s202_s30  }
  0x54   : > { %p1298_p7 = scmp.ne.s32.totalorder %s1290_s25, 0 }
  0x55   : > { %s1118_s28 = sand.u32 (!%p1298_p7), 1, %s913_s16   ;;  %p1299_p3 = scmp.ne.s32.totalorder (!%p1298_p7), %s1288_s23, 0 }
  0x56   : > { %222 = sbr.rel (%p1298_p7) target bundleno = 499 (0x1f3), region = 28  ;;  %s1121_s10 = sshll.u32 (!%p1298_p7), %s1118_s28, 3 }
  0x57   : > { %s225_s5 = scalar_lea.sflag (!%p1298_p7), [#allocation3], %s1118_s28  ;;  %s228_s11 = scalar_lea.vmem (!%p1298_p7), [#allocation2], %s1121_s10 }
  0x5d   : > { %892 = dma.done.wait (%p1299_p3), %s225_s5, 128  }
  0x5e   : > { %894 = vsyncadd (%p1299_p3), %s225_s5, 4294967168  ;;  %p1300_p13 = scmp.eq.s32.totalorder %s1002_s21, 0 }
  0x60   : > { %896 = dma.done.wait (%p1300_p13), [#allocation6], 256   ;;  %p1301_p4 = pmov %p1300_p13 }
  0x61   : > { %v935_v0 = vmov 0.0   ;;  %vm936_vm0 = vmmov 0   ;;  %v723_v1 = vld [vmem:[#allocation5] sm:$0xff]   ;;  %v724_v2 = vld [vmem:[#allocation5 + $0x8] sm:$0xff]   ;;  %v268_v3 = vld [vmem:[%s228_s11] sm:$0xff]  ;;  %vm286_vm1 = vcmask 261120  }
  0x62   : > { %898 = vsyncadd (%p1301_p4), [#allocation6], 4294967040  ;;  %622 = vmatprep.subr.bf16.mxu0 %v935_v0  ;;  %626 = vmatprep.mubr.msk.bf16.mxu0 %vm936_vm0, %v935_v0  ;;  %v269_v4 = vpack.c.bf16 %v268_v3, %v268_v3  ;;  %vm332_vm2 = vcmask 125952   ;;  %s1284_s23 = smov 64   ;;  %s938_s25 = smov 96  }
  0x63   : > { %623 = vmatpush3.bf16.msra.mxu0 %v723_v1  ;;  %s252_s12 = scalar_lea.vmem [#allocation7], %s1121_s10  ;;  %s939_s14 = smov 80  }
  0x64   : > { %624 = vmatprep.subr.bf16.mxu0 %v935_v0  ;;  %s940_s26 = smov 112   ;;  %s941_s30 = smov 48  }
  0x65   : > { %s259_s27 = scalar_lea.vmem [#allocation8], %s1121_s10  ;;  %s389_s7 = sshll.u32 %s252_s12, 4  ;;  %s1148_s7 = int_to_ptr.vmem [resolvable:$true] %s389_s7 }
  0x66   : > { %s406_s13 = sshll.u32 %s259_s27, 4  ;;  %s369_s9 = sand.u32 1, %s1002_s21   ;;  %s1145_s13 = int_to_ptr.vmem [resolvable:$true] %s406_s13 }
  0x67   : > { %625 = vmatpush3.bf16.msra.mxu0 %v724_v2  ;;  %s616_s5 = sshll.u32 %s921_s18, 7  ;;  %s1140_s11 = scalar_lea.vmem [#allocation10], %s1121_s10 }
  0x68   : > { %s1153_s18 = scalar_lea.hbm %s1278_s3, %s616_s5  ;;  %s1167_s21 = scalar_lea.hbm %s1279_s4, %s616_s5 }
  0x69   : > { %s783_s0 = scalar_lea.vmem %s1145_s13, 128  ;;  %s942_s10 = smov [#allocation8]  }
  0x6a   : > { %627 = vmatmul.mubr.msk.bf16.vlgmr.msra.gmra.mrb[0].mxu0 %vm286_vm1, %v269_v4  ;;  %p784_p6 = scmp.ne.s32.totalorder %s1145_s13, %s783_s0 }
  0x6c   : > { %p785_p8 = pnand %p784_p6, %p1065_p10 }
  0x6e   : > { %p786_p12 = pneg %p785_p8 }
 0x13d   : > { %v324_v5 = vpop.f32.mrb[0].mxu0 }
 0x13e   : > { %v330_v6 = vmul.f32 0.25, %v324_v5  ;;  %v614_v7 = vpack.c.bf16 %v324_v5, %v324_v5  ;;  %v628_v8 = vpop.f32.mrb[1].mxu0 }
 0x13f   : > { %v327_v9 = vpop.f32.mrb[2].mxu0 }
 0x140   : > { %v331_v10 = vpack.c.bf16 %v330_v6, %v330_v6  ;;  %342 = vrot.lane.b32.xlu1 %v614_v7, %s1284_s23  ;;  %338 = vrot.lane.b32.xlu0 %v614_v7, %s938_s25  ;;  %v629_v11 = vpop.f32.mrb[3].mxu0  ;;  %s423_s25 = sshll.u32 %s1140_s11, 4  ;;  %s1160_s25 = int_to_ptr.vmem [resolvable:$true] %s423_s25 }
 0x142   : > { %333 = vst.msk [vmem:[%s252_s12] sm:$0xf] %vm332_vm2, %v331_v10 }
 0x144   : > { %354 = vrot.lane.b32.xlu0 %v614_v7, %s939_s14  ;;  %349 = vrot.lane.b32.xlu1 %v331_v10, %s940_s26  ;;  %s1169_s14 = scalar_lea.sflag [#allocation9], %s369_s9  ;;  %s787_s26 = sshll.u32 %s942_s10, 4  ;;  %s788_s26 = int_to_ptr.vmem [resolvable:$false] %s787_s26 }
 0x145   : > { %s789_s1 = scalar_lea.vmem %s788_s26, 256  ;;  %p790_p11 = scmp.lt.s32.totalorder %s1145_s13, %s788_s26 }
 0x146   : > { %p791_p0 = scmp.lt.s32.totalorder %s789_s1, %s783_s0 }
 0x148   : > { %359 = vrot.lane.b32.xlu0 %v614_v7, %s941_s30  ;;  %s1158_s30 = scalar_lea.hbm %s1277_s2, %s616_s5  ;;  %p792_p5 = por %p791_p0, %p790_p11 }
 0x14a   : > { %p793_p9 = pnand %p792_p5, %p786_p12 }
 0x1b2   : > { %v343_v12 = vpop.permute.xlu1 %342  ;;  %v339_v13 = vpop.permute.xlu0 %338 }
 0x1b3   : > { %345 = vst.msk [vmem:[%s1140_s11] sm:$0xf] %vm332_vm2, %v343_v12  ;;  %341 = vst.msk [vmem:[%s259_s27] sm:$0xf] %vm332_vm2, %v339_v13 }
 0x1b6   : > { %v355_v14 = vpop.permute.xlu0 %354  ;;  %v350_v15 = vpop.permute.xlu1 %349 }
 0x1b7   : > { %601 = vst.msk [vmem:[%s259_s27 + $0x4] sm:$0xf] %vm332_vm2, %v355_v14  ;;  %600 = vst.msk [vmem:[%s252_s12 + $0x4] sm:$0xf] %vm332_vm2, %v350_v15 }
 0x1b8   : > { %796 = shalt.err (!%p793_p9)
}
 0x1b9   : > { %s797_s22 = scalar_lea.hbm %s1153_s18, 128  ;;  %s801_s27 = scalar_lea.hbm %s1278_s3, 256 }
 0x1ba   : > { %p798_p1 = scmp.ne.s32.totalorder %s1153_s18, %s797_s22  ;;  %p802_p3 = scmp.lt.u32.totalorder %s1153_s18, %s1278_s3 }
 0x1bb   : > { %p803_p13 = scmp.lt.u32.totalorder %s801_s27, %s797_s22  ;;  %p805_p6 = scmp.lt.u32.totalorder %s797_s22, %s1153_s18 }
 0x1bc   : > { %p799_p2 = pnand %p798_p1, %p1065_p10 }
 0x1bd   : > { %p804_p4 = por %p803_p13, %p802_p3 }
 0x1be   : > { %p800_p7 = pneg %p799_p2 }
 0x1bf   : > { %p806_p8 = por %p805_p6, %p804_p4 }
 0x1c1   : > { %p807_p12 = pnand %p806_p8, %p800_p7 }
 0x1c3   : > { %810 = shalt.err (!%p807_p12)
}
 0x1c4   : > { %s943_s0 = smov 4   ;;  %s1302_s1 = smov 64  }
 0x1c5   : > { %637 = dma.vmem_to_hbm [thread:$0]  (%p1065_p10), %s1145_s13, 128, %s1153_s18, %s1169_s14, %s1302_s1, %s1302_s1, %s943_s0  }
 0x1c6   : > { %s365_s10 = scalar_lea.sflag [#allocation4], %s1118_s28  ;;  %s811_s26 = scalar_lea.vmem %s1148_s7, 128 }
 0x1c7   : > { %p812_p11 = scmp.ne.s32.totalorder %s1148_s7, %s811_s26  ;;  %s944_s22 = smov [#allocation7]  }
 0x1c8   : > { %s815_s23 = sshll.u32 %s944_s22, 4  ;;  %s816_s23 = int_to_ptr.vmem [resolvable:$false] %s815_s23 }
 0x1c9   : > { %p813_p0 = pnand %p812_p11, %p1065_p10  ;;  %s817_s12 = scalar_lea.vmem %s816_s23, 256 }
 0x1ca   : > { %p818_p9 = scmp.lt.s32.totalorder %s1148_s7, %s816_s23  ;;  %p819_p1 = scmp.lt.s32.totalorder %s817_s12, %s811_s26 }
 0x1cb   : > { %p814_p5 = pneg %p813_p0 }
 0x1cc   : > { %p820_p2 = por %p819_p1, %p818_p9 }
 0x1ce   : > { %p821_p7 = pnand %p820_p2, %p814_p5 }
 0x1d0   : > { %824 = shalt.err (!%p821_p7)
}
 0x1d1   : > { %s825_s13 = scalar_lea.hbm %s1158_s30, 128  ;;  %s829_s9 = scalar_lea.hbm %s1277_s2, 256 }
 0x1d2   : > { %p826_p3 = scmp.ne.s32.totalorder %s1158_s30, %s825_s13  ;;  %p830_p6 = scmp.lt.u32.totalorder %s1158_s30, %s1277_s2 }
 0x1d3   : > { %p831_p8 = scmp.lt.u32.totalorder %s829_s9, %s825_s13  ;;  %p833_p11 = scmp.lt.u32.totalorder %s825_s13, %s1158_s30 }
 0x1d4   : > { %p827_p13 = pnand %p826_p3, %p1065_p10 }
 0x1d5   : > { %p832_p12 = por %p831_p8, %p830_p6 }
 0x1d6   : > { %p828_p4 = pneg %p827_p13 }
 0x1d7   : > { %p834_p0 = por %p833_p11, %p832_p12 }
 0x1d9   : > { %p835_p5 = pnand %p834_p0, %p828_p4 }
 0x1db   : > { %838 = shalt.err (!%p835_p5)
}
 0x1dc   : > { %636 = dma.vmem_to_hbm [thread:$0]  (%p1065_p10), %s1148_s7, 128, %s1158_s30, %s365_s10, %s1302_s1, %s1302_s1, %s943_s0   ;;  %v360_v16 = vpop.permute.xlu0 %359 }
 0x1dd   : > { %602 = vst.msk [vmem:[%s1140_s11 + $0x4] sm:$0xf] %vm332_vm2, %v360_v16  ;;  %s839_s26 = scalar_lea.vmem %s1160_s25, 128  ;;  %s945_s23 = smov [#allocation10]  }
 0x1de   : > { %p840_p9 = scmp.ne.s32.totalorder %s1160_s25, %s839_s26  ;;  %s843_s12 = sshll.u32 %s945_s23, 4  ;;  %s844_s12 = int_to_ptr.vmem [resolvable:$false] %s843_s12 }
 0x1df   : > { %s845_s28 = scalar_lea.vmem %s844_s12, 256  ;;  %p846_p7 = scmp.lt.s32.totalorder %s1160_s25, %s844_s12 }
 0x1e0   : > { %p841_p1 = pnand %p840_p9, %p1065_p10  ;;  %p847_p3 = scmp.lt.s32.totalorder %s845_s28, %s839_s26 }
 0x1e2   : > { %p842_p2 = pneg %p841_p1  ;;  %p848_p13 = por %p847_p3, %p846_p7 }
 0x1e4   : > { %p849_p4 = pnand %p848_p13, %p842_p2 }
 0x1e6   : > { %852 = shalt.err (!%p849_p4)
}
 0x1e7   : > { %s853_s7 = scalar_lea.hbm %s1167_s21, 128  ;;  %s857_s10 = scalar_lea.hbm %s1279_s4, 256 }
 0x1e8   : > { %p854_p6 = scmp.ne.s32.totalorder %s1167_s21, %s853_s7  ;;  %p858_p11 = scmp.lt.u32.totalorder %s1167_s21, %s1279_s4 }
 0x1e9   : > { %p859_p0 = scmp.lt.u32.totalorder %s857_s10, %s853_s7  ;;  %p861_p9 = scmp.lt.u32.totalorder %s853_s7, %s1167_s21 }
 0x1ea   : > { %p855_p8 = pnand %p854_p6, %p1065_p10 }
 0x1eb   : > { %p860_p5 = por %p859_p0, %p858_p11 }
 0x1ec   : > { %p856_p12 = pneg %p855_p8 }
 0x1ed   : > { %p862_p1 = por %p861_p9, %p860_p5 }
 0x1ef   : > { %p863_p2 = pnand %p862_p1, %p856_p12 }
 0x1f1   : > { %866 = shalt.err (!%p863_p2)
}
 0x1f2   : > { %638 = dma.vmem_to_hbm [thread:$0]  (%p1065_p10), %s1160_s25, 128, %s1167_s21, %s1169_s14, %s1302_s1, %s1302_s1, %s943_s0  }
 0x1f3 PF: > { %s438_s27 = sand.u32 1, %s909_s15   ;;  %p1303_p7 = scmp.ne.s32.totalorder %s1289_s24, 0 }
 0x1f4   : > { %p1304_p3 = scmp.ge.s32.totalorder %s929_s20, 2  ;;  %s439_s9 = scalar_lea.sflag [#allocation4], %s438_s27 }
 0x1f6   : > { %p651_p13 = pnand %p1304_p3, %p1303_p7 }
 0x1f8   : > { %900 = dma.done.wait (!%p651_p13), %s439_s9, 128  }
 0x1f9   : > { %902 = vsyncadd (!%p651_p13), %s439_s9, 4294967168  ;;  %s1305_s6 = sadd.s32 4294967294, %s929_s20  }
 0x1fa   : > { %s447_s5 = sand.u32 1, %s1305_s6  }
 0x1fb   : > { %s448_s22 = scalar_lea.sflag [#allocation9], %s447_s5 }
 0x1fc   : > { %904 = dma.done.wait (!%p651_p13), %s448_s22, 256  }
 0x1fd   : > { %906 = vsyncadd (!%p651_p13), %s448_s22, 4294967040  ;;  %s25_s20 = sadd.s32 1, %s929_s20   ;;  %s1306_s15 = smov %s913_s16 }
 0x1fe   : > { %p22_p10 = scmp.ge.s32.totalorder %s25_s20, 4   ;;  %s1307_s16 = smov %s917_s17 }
 0x1ff   : > { %s1308_s17 = smov %s1074_s8  ;;  %s1309_s18 = smov %s925_s19 }
 0x200   : > { %s1310_s19 = smov %s1312_s29  ;;  %24 = sbr.rel (!%p22_p10) target bundleno = 12 (0xc), region = 112 }
 0x207   :  { %462 = vsyncpa [#allocation3], 1 }
 0x208   :  { %464 = vsyncpa [#allocation3 + $0x1], 1 }
 0x209   :  { %465 = vsyncpa [#allocation6], 1 }
 0x20a   :  { %466 = vsyncpa [#allocation4], 1 }
 0x20b   :  { %468 = vsyncpa [#allocation4 + $0x1], 1 }
 0x20c   :  { %469 = vsyncpa [#allocation9], 1 }
 0x20d   :  { %471 = vsyncpa [#allocation9 + $0x1], 1 }

</bundles_post_ra>
